<compile_context>
chip_gen: v7x
topology: tpu7x:2x2x1
jax: 0.10.0
libtpu: 0.0.40
codegen_flags: <defaults>
</compile_context>

<pallas_src>
import functools

import jax
import jax.numpy as jnp
from jax.experimental import pallas as pl
from jax.experimental.pallas import tpu as pltpu


def _leaky_relu(x, slope=0.2):
    return jnp.where(x > 0, x, slope * x)


def vae_kernel(
    # inputs
    x_ref, eps_ref,
    w_in_ref, b_in_ref,          # Encoder.FC_input
    w_in2_ref, b_in2_ref,        # Encoder.FC_input2
    w_mv_ref, b_mv_ref,          # Encoder.FC_mean || FC_var (packed)
    w_h_ref, b_h_ref,            # Decoder.FC_hidden
    w_h2_ref, b_h2_ref,          # Decoder.FC_hidden2
    w_out_ref, b_out_ref,        # Decoder.FC_output
    # outputs
    xhat_ref, mv_ref,
    *, latent_dim, mxu_dtype,
):
    def mm(a, w_ref):
        # MXU matmul; optionally feed bf16 operands, always accumulate in f32.
        return jnp.dot(
            a.astype(mxu_dtype),
            w_ref[...].astype(mxu_dtype),
            preferred_element_type=jnp.float32,
        )

    x = x_ref[...].astype(jnp.float32)
    eps = eps_ref[...].astype(jnp.float32)

    # ---------------- Encoder ----------------
    h = _leaky_relu(mm(x, w_in_ref) + b_in_ref[...])
    h = _leaky_relu(mm(h, w_in2_ref) + b_in2_ref[...])

    # Fused mean/log_var projection: one matmul, lane-dense (tile, 2*latent).
    mv = mm(h, w_mv_ref) + b_mv_ref[...]
    mean = mv[:, :latent_dim]
    log_var = mv[:, latent_dim:]

    # ------------- Reparameterization -------------
    std = jnp.exp(0.5 * log_var)
    z = mean + std * eps

    # ---------------- Decoder ----------------
    d = _leaky_relu(mm(z, w_h_ref) + b_h_ref[...])
    d = _leaky_relu(mm(d, w_h2_ref) + b_h2_ref[...])
    x_hat = jnp.tanh(mm(d, w_out_ref) + b_out_ref[...])

    xhat_ref[...] = x_hat.astype(xhat_ref.dtype)
    mv_ref[...] = mv.astype(mv_ref.dtype)


def _choose_batch_tile(B, target=256):
    """Whole batch if small; otherwise largest mult-of-8 divisor <= target so
    the batch grid stays >= 2 (megacore-shardable on v7x)."""
    if B <= target:
        return B
    for t in range(target, 7, -1):
        if B % t == 0 and t % 8 == 0:
            return t
    return B  # fallback: single step with full batch


def vae_forward(x, eps, params, *, batch_tile=None, mxu_dtype=jnp.float32):
    """VAE forward as one Pallas kernel.

    x:   (B, x_dim) float32
    eps: (B, latent_dim) float32, ~N(0,1)
    params: dict of pre-transposed weights (in, out) and biases (1, out)
    Returns (x_hat, mean, log_var).
    """
    B, x_dim = x.shape
    latent_dim = eps.shape[1]
    hidden_dim = params["w_in"].shape[1]

    if batch_tile is None:
        batch_tile = _choose_batch_tile(B)
    assert B % batch_tile == 0, "batch must be divisible by batch_tile"
    grid = (B // batch_tile,)

    # Pack mean/var projection into a single (hidden, 2*latent) weight + bias.
    w_mv = jnp.concatenate([params["w_mean"], params["w_var"]], axis=1)
    b_mv = jnp.concatenate([params["b_mean"], params["b_var"]], axis=1)

    weight_args = [
        params["w_in"], params["b_in"],
        params["w_in2"], params["b_in2"],
        w_mv, b_mv,
        params["w_h"], params["b_h"],
        params["w_h2"], params["b_h2"],
        params["w_out"], params["b_out"],
    ]

    def batch_spec(feat):
        return pl.BlockSpec((batch_tile, feat), lambda i: (i, 0))

    def weight_spec(arr):
        # Full weight/bias tile, constant block index (resident every step).
        return pl.BlockSpec(arr.shape, lambda i: (0, 0))

    in_specs = [batch_spec(x_dim), batch_spec(latent_dim)] + [
        weight_spec(a) for a in weight_args
    ]
    out_specs = [
        batch_spec(x_dim),            # x_hat
        batch_spec(2 * latent_dim),   # packed mean||log_var (lane-dense)
    ]
    out_shape = (
        jax.ShapeDtypeStruct((B, x_dim), jnp.float32),
        jax.ShapeDtypeStruct((B, 2 * latent_dim), jnp.float32),
    )

    # Advisory cost estimate for XLA scheduling.
    flops = 2 * B * (
        x_dim * hidden_dim + hidden_dim * hidden_dim
        + hidden_dim * 2 * latent_dim
        + latent_dim * hidden_dim + hidden_dim * hidden_dim
        + hidden_dim * x_dim
    )
    transcendentals = B * (latent_dim + x_dim)  # exp + tanh
    bytes_accessed = 4 * (
        x.size + eps.size + sum(int(a.size) for a in weight_args)
        + B * x_dim + B * 2 * latent_dim
    )

    kernel = functools.partial(
        vae_kernel, latent_dim=latent_dim, mxu_dtype=mxu_dtype
    )

    x_hat, mv = pl.pallas_call(
        kernel,
        out_shape=out_shape,
        grid_spec=pltpu.PrefetchScalarGridSpec(
            num_scalar_prefetch=0,
            grid=grid,
            in_specs=in_specs,
            out_specs=out_specs,
        ),
        compiler_params=pltpu.CompilerParams(
            dimension_semantics=("parallel",)
        ),
        cost_estimate=pl.CostEstimate(
            flops=flops,
            transcendentals=transcendentals,
            bytes_accessed=bytes_accessed,
        ),
    )(x, eps, *weight_args)

    mean = mv[:, :latent_dim]
    log_var = mv[:, latent_dim:]
    return x_hat, mean, log_var


def init_params(key, x_dim, hidden_dim, latent_dim):
    """Deterministic parameter init. Weights are stored pre-transposed as
    (in_features, out_features); biases as (1, out_features)."""
    names_shapes = [
        ("w_in", (x_dim, hidden_dim)), ("b_in", (1, hidden_dim)),
        ("w_in2", (hidden_dim, hidden_dim)), ("b_in2", (1, hidden_dim)),
        ("w_mean", (hidden_dim, latent_dim)), ("b_mean", (1, latent_dim)),
        ("w_var", (hidden_dim, latent_dim)), ("b_var", (1, latent_dim)),
        ("w_h", (latent_dim, hidden_dim)), ("b_h", (1, hidden_dim)),
        ("w_h2", (hidden_dim, hidden_dim)), ("b_h2", (1, hidden_dim)),
        ("w_out", (hidden_dim, x_dim)), ("b_out", (1, x_dim)),
    ]
    params = {}
    keys = jax.random.split(key, len(names_shapes))
    for (name, shape), k in zip(names_shapes, keys):
        fan_in = shape[0] if name.startswith("w") else shape[1]
        bound = 1.0 / jnp.sqrt(jnp.float32(fan_in))
        params[name] = jax.random.uniform(
            k, shape, dtype=jnp.float32, minval=-bound, maxval=bound
        )
    return params


def vae_reference(x, eps, p):
    """Pure-JAX reference for correctness checking."""
    lrelu = lambda v: jnp.where(v > 0, v, 0.2 * v)
    h = lrelu(x @ p["w_in"] + p["b_in"])
    h = lrelu(h @ p["w_in2"] + p["b_in2"])
    mean = h @ p["w_mean"] + p["b_mean"]
    log_var = h @ p["w_var"] + p["b_var"]
    z = mean + jnp.exp(0.5 * log_var) * eps
    d = lrelu(z @ p["w_h"] + p["b_h"])
    d = lrelu(d @ p["w_h2"] + p["b_h2"])
    x_hat = jnp.tanh(d @ p["w_out"] + p["b_out"])
    return x_hat, mean, log_var


if __name__ == "__main__":
    # Small shapes consistent with the module's forward.
    B, X_DIM, HIDDEN_DIM, LATENT_DIM = 16, 64, 32, 16

    root = jax.random.PRNGKey(0)
    k_params, k_x, k_eps = jax.random.split(root, 3)

    params = init_params(k_params, X_DIM, HIDDEN_DIM, LATENT_DIM)
    x = jax.random.normal(k_x, (B, X_DIM), dtype=jnp.float32)
    # torch.randn_like(var) equivalent, generated deterministically here.
    eps = jax.random.normal(k_eps, (B, LATENT_DIM), dtype=jnp.float32)

    r_xhat, r_mean, r_logvar = vae_reference(x, eps, params)

    # f32 MXU path (tight tolerance). Whole batch in one grid step here.
    fwd_f32 = jax.jit(functools.partial(vae_forward, mxu_dtype=jnp.float32))
    x_hat, mean, log_var = fwd_f32(x, eps, params)
    jax.block_until_ready((x_hat, mean, log_var))

    assert jnp.allclose(x_hat, r_xhat, atol=1e-5, rtol=1e-5)
    assert jnp.allclose(mean, r_mean, atol=1e-5, rtol=1e-5)
    assert jnp.allclose(log_var, r_logvar, atol=1e-5, rtol=1e-5)
    assert x_hat.shape == (B, X_DIM)
    assert mean.shape == (B, LATENT_DIM)
    assert log_var.shape == (B, LATENT_DIM)

    # bf16-at-MXU path (v6e/v7x throughput mode); f32 accumulation keeps the
    # result close to the f32 reference.
    fwd_bf16 = jax.jit(functools.partial(vae_forward, mxu_dtype=jnp.bfloat16))
    xb, mb, lb = fwd_bf16(x, eps, params)
    jax.block_until_ready((xb, mb, lb))
    assert jnp.allclose(xb, r_xhat, atol=1e-1, rtol=1e-1)
    assert jnp.allclose(mb, r_mean, atol=1e-1, rtol=1e-1)
    assert jnp.allclose(lb, r_logvar, atol=1e-1, rtol=1e-1)

    print("KERNEL_OK")
</pallas_src>

<mosaic_0001>
module attributes {stable_mosaic.version = 11 : i64} {
  func.func @vae_kernel(%arg0: i32, %arg1: memref<16x64xf32, #tpu.memory_space<vmem>>, %arg2: memref<16x16xf32, #tpu.memory_space<vmem>>, %arg3: memref<64x32xf32, #tpu.memory_space<vmem>>, %arg4: memref<1x32xf32, #tpu.memory_space<vmem>>, %arg5: memref<32x32xf32, #tpu.memory_space<vmem>>, %arg6: memref<1x32xf32, #tpu.memory_space<vmem>>, %arg7: memref<32x32xf32, #tpu.memory_space<vmem>>, %arg8: memref<1x32xf32, #tpu.memory_space<vmem>>, %arg9: memref<16x32xf32, #tpu.memory_space<vmem>>, %arg10: memref<1x32xf32, #tpu.memory_space<vmem>>, %arg11: memref<32x32xf32, #tpu.memory_space<vmem>>, %arg12: memref<1x32xf32, #tpu.memory_space<vmem>>, %arg13: memref<32x64xf32, #tpu.memory_space<vmem>>, %arg14: memref<1x64xf32, #tpu.memory_space<vmem>>, %arg15: memref<16x64xf32, #tpu.memory_space<vmem>>, %arg16: memref<16x32xf32, #tpu.memory_space<vmem>>) attributes {dimension_semantics = [#tpu.dimension_semantics<parallel>], iteration_bounds = array<i64: 1>, scalar_prefetch = 0 : i64, scratch_operands = 0 : i64, tpu.core_type = #tpu.core_type<tc>, window_params = [{transform_indices = @transform_0, window_bounds = array<i64: 16, 64>}, {transform_indices = @transform_1, window_bounds = array<i64: 16, 16>}, {pipeline_mode = #tpu.pipeline_mode<synchronous>, transform_indices = @transform_2, window_bounds = array<i64: 64, 32>}, {pipeline_mode = #tpu.pipeline_mode<synchronous>, transform_indices = @transform_3, window_bounds = array<i64: 1, 32>}, {pipeline_mode = #tpu.pipeline_mode<synchronous>, transform_indices = @transform_4, window_bounds = array<i64: 32, 32>}, {pipeline_mode = #tpu.pipeline_mode<synchronous>, transform_indices = @transform_5, window_bounds = array<i64: 1, 32>}, {pipeline_mode = #tpu.pipeline_mode<synchronous>, transform_indices = @transform_6, window_bounds = array<i64: 32, 32>}, {pipeline_mode = #tpu.pipeline_mode<synchronous>, transform_indices = @transform_7, window_bounds = array<i64: 1, 32>}, {pipeline_mode = #tpu.pipeline_mode<synchronous>, transform_indices = @transform_8, window_bounds = array<i64: 16, 32>}, {pipeline_mode = #tpu.pipeline_mode<synchronous>, transform_indices = @transform_9, window_bounds = array<i64: 1, 32>}, {pipeline_mode = #tpu.pipeline_mode<synchronous>, transform_indices = @transform_10, window_bounds = array<i64: 32, 32>}, {pipeline_mode = #tpu.pipeline_mode<synchronous>, transform_indices = @transform_11, window_bounds = array<i64: 1, 32>}, {pipeline_mode = #tpu.pipeline_mode<synchronous>, transform_indices = @transform_12, window_bounds = array<i64: 32, 64>}, {pipeline_mode = #tpu.pipeline_mode<synchronous>, transform_indices = @transform_13, window_bounds = array<i64: 1, 64>}, {transform_indices = @transform_14, window_bounds = array<i64: 16, 64>}, {transform_indices = @transform_15, window_bounds = array<i64: 16, 32>}]} {
    %c0 = arith.constant 0 : index
    %c0_0 = arith.constant 0 : index
    %0 = vector.load %arg1[%c0, %c0_0] : memref<16x64xf32, #tpu.memory_space<vmem>>, vector<16x64xf32>
    %c0_1 = arith.constant 0 : index
    %c0_2 = arith.constant 0 : index
    %1 = vector.load %arg2[%c0_1, %c0_2] : memref<16x16xf32, #tpu.memory_space<vmem>>, vector<16x16xf32>
    %c0_3 = arith.constant 0 : index
    %c0_4 = arith.constant 0 : index
    %2 = vector.load %arg3[%c0_3, %c0_4] : memref<64x32xf32, #tpu.memory_space<vmem>>, vector<64x32xf32>
    %cst = arith.constant dense<0.000000e+00> : vector<16x32xf32>
    %3 = tpu.matmul %0, %2, %cst {dimension_numbers = #tpu.dot_dimension_numbers<[1], [0], [0], [1], [0, 0, 1, 1], [], []>} : vector<16x64xf32>, vector<64x32xf32>, vector<16x32xf32> -> vector<16x32xf32>
    %c0_5 = arith.constant 0 : index
    %c0_6 = arith.constant 0 : index
    %4 = vector.load %arg4[%c0_5, %c0_6] : memref<1x32xf32, #tpu.memory_space<vmem>>, vector<1x32xf32>
    %5 = vector.broadcast %4 : vector<1x32xf32> to vector<16x32xf32>
    %6 = arith.addf %3, %5 : vector<16x32xf32>
    %cst_7 = arith.constant 0.000000e+00 : f32
    %7 = vector.broadcast %cst_7 : f32 to vector<16x32xf32>
    %8 = arith.cmpf ogt, %6, %7 : vector<16x32xf32>
    %cst_8 = arith.constant 2.000000e-01 : f32
    %9 = vector.broadcast %cst_8 : f32 to vector<16x32xf32>
    %10 = arith.mulf %9, %6 : vector<16x32xf32>
    %11 = arith.select %8, %6, %10 : vector<16x32xi1>, vector<16x32xf32>
    %c0_9 = arith.constant 0 : index
    %c0_10 = arith.constant 0 : index
    %12 = vector.load %arg5[%c0_9, %c0_10] : memref<32x32xf32, #tpu.memory_space<vmem>>, vector<32x32xf32>
    %cst_11 = arith.constant dense<0.000000e+00> : vector<16x32xf32>
    %13 = tpu.matmul %11, %12, %cst_11 {dimension_numbers = #tpu.dot_dimension_numbers<[1], [0], [0], [1], [0, 0, 1, 1], [], []>} : vector<16x32xf32>, vector<32x32xf32>, vector<16x32xf32> -> vector<16x32xf32>
    %c0_12 = arith.constant 0 : index
    %c0_13 = arith.constant 0 : index
    %14 = vector.load %arg6[%c0_12, %c0_13] : memref<1x32xf32, #tpu.memory_space<vmem>>, vector<1x32xf32>
    %15 = vector.broadcast %14 : vector<1x32xf32> to vector<16x32xf32>
    %16 = arith.addf %13, %15 : vector<16x32xf32>
    %cst_14 = arith.constant 0.000000e+00 : f32
    %17 = vector.broadcast %cst_14 : f32 to vector<16x32xf32>
    %18 = arith.cmpf ogt, %16, %17 : vector<16x32xf32>
    %cst_15 = arith.constant 2.000000e-01 : f32
    %19 = vector.broadcast %cst_15 : f32 to vector<16x32xf32>
    %20 = arith.mulf %19, %16 : vector<16x32xf32>
    %21 = arith.select %18, %16, %20 : vector<16x32xi1>, vector<16x32xf32>
    %c0_16 = arith.constant 0 : index
    %c0_17 = arith.constant 0 : index
    %22 = vector.load %arg7[%c0_16, %c0_17] : memref<32x32xf32, #tpu.memory_space<vmem>>, vector<32x32xf32>
    %cst_18 = arith.constant dense<0.000000e+00> : vector<16x32xf32>
    %23 = tpu.matmul %21, %22, %cst_18 {dimension_numbers = #tpu.dot_dimension_numbers<[1], [0], [0], [1], [0, 0, 1, 1], [], []>} : vector<16x32xf32>, vector<32x32xf32>, vector<16x32xf32> -> vector<16x32xf32>
    %c0_19 = arith.constant 0 : index
    %c0_20 = arith.constant 0 : index
    %24 = vector.load %arg8[%c0_19, %c0_20] : memref<1x32xf32, #tpu.memory_space<vmem>>, vector<1x32xf32>
    %25 = vector.broadcast %24 : vector<1x32xf32> to vector<16x32xf32>
    %26 = arith.addf %23, %25 : vector<16x32xf32>
    %27 = vector.extract_strided_slice %26 {offsets = [0, 0], sizes = [16, 16], strides = [1, 1]} : vector<16x32xf32> to vector<16x16xf32>
    %28 = vector.extract_strided_slice %26 {offsets = [0, 16], sizes = [16, 16], strides = [1, 1]} : vector<16x32xf32> to vector<16x16xf32>
    %cst_21 = arith.constant 5.000000e-01 : f32
    %29 = vector.broadcast %cst_21 : f32 to vector<16x16xf32>
    %30 = arith.mulf %29, %28 : vector<16x16xf32>
    %31 = math.exp %30 : vector<16x16xf32>
    %32 = arith.mulf %31, %1 : vector<16x16xf32>
    %33 = arith.addf %27, %32 : vector<16x16xf32>
    %c0_22 = arith.constant 0 : index
    %c0_23 = arith.constant 0 : index
    %34 = vector.load %arg9[%c0_22, %c0_23] : memref<16x32xf32, #tpu.memory_space<vmem>>, vector<16x32xf32>
    %cst_24 = arith.constant dense<0.000000e+00> : vector<16x32xf32>
    %35 = tpu.matmul %33, %34, %cst_24 {dimension_numbers = #tpu.dot_dimension_numbers<[1], [0], [0], [1], [0, 0, 1, 1], [], []>} : vector<16x16xf32>, vector<16x32xf32>, vector<16x32xf32> -> vector<16x32xf32>
    %c0_25 = arith.constant 0 : index
    %c0_26 = arith.constant 0 : index
    %36 = vector.load %arg10[%c0_25, %c0_26] : memref<1x32xf32, #tpu.memory_space<vmem>>, vector<1x32xf32>
    %37 = vector.broadcast %36 : vector<1x32xf32> to vector<16x32xf32>
    %38 = arith.addf %35, %37 : vector<16x32xf32>
    %cst_27 = arith.constant 0.000000e+00 : f32
    %39 = vector.broadcast %cst_27 : f32 to vector<16x32xf32>
    %40 = arith.cmpf ogt, %38, %39 : vector<16x32xf32>
    %cst_28 = arith.constant 2.000000e-01 : f32
    %41 = vector.broadcast %cst_28 : f32 to vector<16x32xf32>
    %42 = arith.mulf %41, %38 : vector<16x32xf32>
    %43 = arith.select %40, %38, %42 : vector<16x32xi1>, vector<16x32xf32>
    %c0_29 = arith.constant 0 : index
    %c0_30 = arith.constant 0 : index
    %44 = vector.load %arg11[%c0_29, %c0_30] : memref<32x32xf32, #tpu.memory_space<vmem>>, vector<32x32xf32>
    %cst_31 = arith.constant dense<0.000000e+00> : vector<16x32xf32>
    %45 = tpu.matmul %43, %44, %cst_31 {dimension_numbers = #tpu.dot_dimension_numbers<[1], [0], [0], [1], [0, 0, 1, 1], [], []>} : vector<16x32xf32>, vector<32x32xf32>, vector<16x32xf32> -> vector<16x32xf32>
    %c0_32 = arith.constant 0 : index
    %c0_33 = arith.constant 0 : index
    %46 = vector.load %arg12[%c0_32, %c0_33] : memref<1x32xf32, #tpu.memory_space<vmem>>, vector<1x32xf32>
    %47 = vector.broadcast %46 : vector<1x32xf32> to vector<16x32xf32>
    %48 = arith.addf %45, %47 : vector<16x32xf32>
    %cst_34 = arith.constant 0.000000e+00 : f32
    %49 = vector.broadcast %cst_34 : f32 to vector<16x32xf32>
    %50 = arith.cmpf ogt, %48, %49 : vector<16x32xf32>
    %cst_35 = arith.constant 2.000000e-01 : f32
    %51 = vector.broadcast %cst_35 : f32 to vector<16x32xf32>
    %52 = arith.mulf %51, %48 : vector<16x32xf32>
    %53 = arith.select %50, %48, %52 : vector<16x32xi1>, vector<16x32xf32>
    %c0_36 = arith.constant 0 : index
    %c0_37 = arith.constant 0 : index
    %54 = vector.load %arg13[%c0_36, %c0_37] : memref<32x64xf32, #tpu.memory_space<vmem>>, vector<32x64xf32>
    %cst_38 = arith.constant dense<0.000000e+00> : vector<16x64xf32>
    %55 = tpu.matmul %53, %54, %cst_38 {dimension_numbers = #tpu.dot_dimension_numbers<[1], [0], [0], [1], [0, 0, 1, 1], [], []>} : vector<16x32xf32>, vector<32x64xf32>, vector<16x64xf32> -> vector<16x64xf32>
    %c0_39 = arith.constant 0 : index
    %c0_40 = arith.constant 0 : index
    %56 = vector.load %arg14[%c0_39, %c0_40] : memref<1x64xf32, #tpu.memory_space<vmem>>, vector<1x64xf32>
    %57 = vector.broadcast %56 : vector<1x64xf32> to vector<16x64xf32>
    %58 = arith.addf %55, %57 : vector<16x64xf32>
    %59 = math.tanh %58 : vector<16x64xf32>
    %c0_41 = arith.constant 0 : index
    %c0_42 = arith.constant 0 : index
    %60 = vector.load %arg15[%c0_41, %c0_42] : memref<16x64xf32, #tpu.memory_space<vmem>>, vector<16x64xf32>
    tpu.vector_store %arg15[%c0_41, %c0_42], %59 {strides = array<i32>} : memref<16x64xf32, #tpu.memory_space<vmem>>, vector<16x64xf32>,
    %c0_43 = arith.constant 0 : index
    %c0_44 = arith.constant 0 : index
    %61 = vector.load %arg16[%c0_43, %c0_44] : memref<16x32xf32, #tpu.memory_space<vmem>>, vector<16x32xf32>
    tpu.vector_store %arg16[%c0_43, %c0_44], %26 {strides = array<i32>} : memref<16x32xf32, #tpu.memory_space<vmem>>, vector<16x32xf32>,
    return
  }
  func.func @transform_0(%arg0: i32) -> (i32, i32) {
    %c0_i32 = arith.constant 0 : i32
    %c0_i32_0 = arith.constant 0 : i32
    return %arg0, %c0_i32 : i32, i32
  }
  func.func @transform_1(%arg0: i32) -> (i32, i32) {
    %c0_i32 = arith.constant 0 : i32
    %c0_i32_0 = arith.constant 0 : i32
    return %arg0, %c0_i32 : i32, i32
  }
  func.func @transform_2(%arg0: i32) -> (i32, i32) {
    %c0_i32 = arith.constant 0 : i32
    %c0_i32_0 = arith.constant 0 : i32
    %c0_i32_1 = arith.constant 0 : i32
    return %c0_i32, %c0_i32_0 : i32, i32
  }
  func.func @transform_3(%arg0: i32) -> (i32, i32) {
    %c0_i32 = arith.constant 0 : i32
    %c0_i32_0 = arith.constant 0 : i32
    %c0_i32_1 = arith.constant 0 : i32
    return %c0_i32, %c0_i32_0 : i32, i32
  }
  func.func @transform_4(%arg0: i32) -> (i32, i32) {
    %c0_i32 = arith.constant 0 : i32
    %c0_i32_0 = arith.constant 0 : i32
    %c0_i32_1 = arith.constant 0 : i32
    return %c0_i32, %c0_i32_0 : i32, i32
  }
  func.func @transform_5(%arg0: i32) -> (i32, i32) {
    %c0_i32 = arith.constant 0 : i32
    %c0_i32_0 = arith.constant 0 : i32
    %c0_i32_1 = arith.constant 0 : i32
    return %c0_i32, %c0_i32_0 : i32, i32
  }
  func.func @transform_6(%arg0: i32) -> (i32, i32) {
    %c0_i32 = arith.constant 0 : i32
    %c0_i32_0 = arith.constant 0 : i32
    %c0_i32_1 = arith.constant 0 : i32
    return %c0_i32, %c0_i32_0 : i32, i32
  }
  func.func @transform_7(%arg0: i32) -> (i32, i32) {
    %c0_i32 = arith.constant 0 : i32
    %c0_i32_0 = arith.constant 0 : i32
    %c0_i32_1 = arith.constant 0 : i32
    return %c0_i32, %c0_i32_0 : i32, i32
  }
  func.func @transform_8(%arg0: i32) -> (i32, i32) {
    %c0_i32 = arith.constant 0 : i32
    %c0_i32_0 = arith.constant 0 : i32
    %c0_i32_1 = arith.constant 0 : i32
    return %c0_i32, %c0_i32_0 : i32, i32
  }
  func.func @transform_9(%arg0: i32) -> (i32, i32) {
    %c0_i32 = arith.constant 0 : i32
    %c0_i32_0 = arith.constant 0 : i32
    %c0_i32_1 = arith.constant 0 : i32
    return %c0_i32, %c0_i32_0 : i32, i32
  }
  func.func @transform_10(%arg0: i32) -> (i32, i32) {
    %c0_i32 = arith.constant 0 : i32
    %c0_i32_0 = arith.constant 0 : i32
    %c0_i32_1 = arith.constant 0 : i32
    return %c0_i32, %c0_i32_0 : i32, i32
  }
  func.func @transform_11(%arg0: i32) -> (i32, i32) {
    %c0_i32 = arith.constant 0 : i32
    %c0_i32_0 = arith.constant 0 : i32
    %c0_i32_1 = arith.constant 0 : i32
    return %c0_i32, %c0_i32_0 : i32, i32
  }
  func.func @transform_12(%arg0: i32) -> (i32, i32) {
    %c0_i32 = arith.constant 0 : i32
    %c0_i32_0 = arith.constant 0 : i32
    %c0_i32_1 = arith.constant 0 : i32
    return %c0_i32, %c0_i32_0 : i32, i32
  }
  func.func @transform_13(%arg0: i32) -> (i32, i32) {
    %c0_i32 = arith.constant 0 : i32
    %c0_i32_0 = arith.constant 0 : i32
    %c0_i32_1 = arith.constant 0 : i32
    return %c0_i32, %c0_i32_0 : i32, i32
  }
  func.func @transform_14(%arg0: i32) -> (i32, i32) {
    %c0_i32 = arith.constant 0 : i32
    %c0_i32_0 = arith.constant 0 : i32
    return %arg0, %c0_i32 : i32, i32
  }
  func.func @transform_15(%arg0: i32) -> (i32, i32) {
    %c0_i32 = arith.constant 0 : i32
    %c0_i32_0 = arith.constant 0 : i32
    return %arg0, %c0_i32 : i32, i32
  }
}

</mosaic_0001>

<bundles_post_ra>
// kernel: vae_forward.1
= control target key start
LH: loop header
LB: loop body
LE: loop exit
PB: predicated region body
PF: predicated region fallthrough
CT: control target
= control target key end

     0   :  { %vm69_vm0 = vcmask 523264   ;;  %s1127_s0 = inlined_call_operand.vmem [shape: f32[16,64], index: 0, kind: input, shape index: {}]   ;;  %s1128_s1 = inlined_call_operand.vmem [shape: f32[16,16], index: 1, kind: input, shape index: {}]   ;;  %s1129_s2 = inlined_call_operand.vmem [shape: f32[64,32], index: 2, kind: input, shape index: {}]   ;;  %s1130_s3 = inlined_call_operand.vmem [shape: f32[1,32], index: 3, kind: input, shape index: {}]   ;;  %s1131_s4 = inlined_call_operand.vmem [shape: f32[32,32], index: 4, kind: input, shape index: {}]   ;;  %s1132_s5 = inlined_call_operand.vmem [shape: f32[1,32], index: 5, kind: input, shape index: {}]   ;;  %s1133_s6 = inlined_call_operand.vmem [shape: f32[32,32], index: 6, kind: input, shape index: {}]   ;;  %s1134_s7 = inlined_call_operand.vmem [shape: f32[1,32], index: 7, kind: input, shape index: {}]   ;;  %s1135_s8 = inlined_call_operand.vmem [shape: f32[16,32], index: 8, kind: input, shape index: {}]   ;;  %s1136_s9 = inlined_call_operand.vmem [shape: f32[1,32], index: 9, kind: input, shape index: {}]   ;;  %s1137_s10 = inlined_call_operand.vmem [shape: f32[32,32], index: 10, kind: input, shape index: {}]   ;;  %s1138_s11 = inlined_call_operand.vmem [shape: f32[1,32], index: 11, kind: input, shape index: {}]   ;;  %s1139_s12 = inlined_call_operand.vmem [shape: f32[32,64], index: 12, kind: input, shape index: {}]   ;;  %s1140_s13 = inlined_call_operand.vmem [shape: f32[1,64], index: 13, kind: input, shape index: {}]   ;;  %s1141_s14 = inlined_call_operand.hbm [shape: f32[16,64], index: 14, kind: output, shape index: {0}]   ;;  %s1142_s15 = inlined_call_operand.vmem [shape: f32[16,32], index: 15, kind: output, shape index: {1}]  }
   0x1   :  { %v54_v0 = vld [vmem:[%s1129_s2] sm:$0xff]  ;;  %v55_v1 = vld [vmem:[%s1129_s2 + $0x8] sm:$0xff]  ;;  %v56_v2 = vld [vmem:[%s1129_s2 + $0x10] sm:$0xff] }
   0x2   :  { %v813_v3 = vpack.c.bf16 %v55_v1, %v54_v0  ;;  %v57_v4 = vld [vmem:[%s1129_s2 + $0x18] sm:$0xff]  ;;  %v58_v6 = vld [vmem:[%s1129_s2 + $0x20] sm:$0xff]  ;;  %v59_v7 = vld [vmem:[%s1129_s2 + $0x28] sm:$0xff] }
   0x3   :  { %v817_v5 = vpack.c.bf16 %v57_v4, %v56_v2  ;;  %v50_v8 = vld [vmem:[%s1127_s0] sm:$0xff] }
   0x4   :  { %814 = vmatprep.subr.bf16.mxu0 %v813_v3  ;;  %759 = vmatprep.mubr.msk.f32.mxu0 %vm69_vm0, %v50_v8 }
   0x5   :  { %21 = vsyncpa [#allocation3], 0  ;;  %816 = vmatpush3.bf16.msra.mxu0 %v813_v3  ;;  %v821_v9 = vpack.c.bf16 %v59_v7, %v58_v6  ;;  %v60_v10 = vld [vmem:[%s1129_s2 + $0x30] sm:$0xff]  ;;  %v61_v11 = vld [vmem:[%s1129_s2 + $0x38] sm:$0xff]  ;;  %vm168_vm3 = vcmask 261120   ;;  %s902_s24 = smov 16  }
   0x6   :  { %818 = vmatprep.subr.bf16.mxu0 %v817_v5  ;;  %v825_v12 = vpack.c.bf16 %v61_v11, %v60_v10  ;;  %v51_v13 = vld [vmem:[%s1127_s0 + $0x8] sm:$0xff]  ;;  %v157_v14 = vld [vmem:[%s1131_s4] sm:$0xff]  ;;  %v159_v17 = vld [vmem:[%s1131_s4 + $0x10] sm:$0xff]  ;;  %vm383_vm6 = vcmask 130048  }
   0x7   :  { %v158_v15 = vld [vmem:[%s1131_s4 + $0x8] sm:$0xff]  ;;  %v160_v18 = vld [vmem:[%s1131_s4 + $0x18] sm:$0xff]  ;;  %v687_v20 = vld [vmem:[%s1130_s3] ss:$0 sm:$0xff] }
   0x8   :  { %v829_v16 = vpack.c.bf16 %v158_v15, %v157_v14  ;;  %v833_v19 = vpack.c.bf16 %v160_v18, %v159_v17  ;;  %v256_v29 = vld [vmem:[%s1133_s6] sm:$0xff]  ;;  %v257_v30 = vld [vmem:[%s1133_s6 + $0x8] sm:$0xff]  ;;  %v258_v32 = vld [vmem:[%s1133_s6 + $0x10] sm:$0xff] }
   0x9   :  { %820 = vmatpush3.bf16.msra.mxu0 %v817_v5  ;;  %v837_v31 = vpack.c.bf16 %v257_v30, %v256_v29  ;;  %v259_v33 = vld [vmem:[%s1133_s6 + $0x18] sm:$0xff]  ;;  %v52_v35 = vld [vmem:[%s1128_s1] sm:$0xff]  ;;  %v53_v36 = vld [vmem:[%s1128_s1 + $0x8] sm:$0xff] }
   0xa   :  { %822 = vmatprep.subr.bf16.mxu0 %v821_v9  ;;  %830 = vmatprep.subr.bf16.mxu1 %v829_v16  ;;  %v841_v34 = vpack.c.bf16 %v259_v33, %v258_v32  ;;  %v690_v37 = vld [vmem:[%s1132_s5] ss:$0 sm:$0xff]  ;;  %v375_v56 = vld [vmem:[%s1135_s8 + $0x8] sm:$0xff]  ;;  %v473_v7 = vld [vmem:[%s1137_s10 + $0x10] sm:$0xff] }
   0xb   :  { %832 = vmatpush3.bf16.msra.mxu1 %v829_v16  ;;  %356 = vrot.lane.b32.xlu0 %v52_v35, %s902_s24  ;;  %v693_v46 = vld [vmem:[%s1134_s7] ss:$0 sm:$0xff]  ;;  %v472_v5 = vld [vmem:[%s1137_s10 + $0x8] sm:$0xff]  ;;  %v474_v8 = vld [vmem:[%s1137_s10 + $0x18] sm:$0xff] }
   0xc   :  { %834 = vmatprep.subr.bf16.mxu1 %v833_v19  ;;  %v374_v55 = vld [vmem:[%s1135_s8] sm:$0xff] }
   0xd   :  { %824 = vmatpush3.bf16.msra.mxu0 %v821_v9  ;;  %v845_v57 = vpack.c.bf16 %v375_v56, %v374_v55  ;;  %v471_v4 = vld [vmem:[%s1137_s10] sm:$0xff]  ;;  %v853_v9 = vpack.c.bf16 %v474_v8, %v473_v7 }
   0xe   :  { %826 = vmatprep.subr.bf16.mxu0 %v825_v12  ;;  %v849_v6 = vpack.c.bf16 %v472_v5, %v471_v4  ;;  %v696_v10 = vld [vmem:[%s1136_s9] ss:$0 sm:$0xff] }
   0xf   :  { %836 = vmatpush3.bf16.msra.mxu1 %v833_v19  ;;  %358 = vrot.lane.b32.xlu0 %v53_v36, %s902_s24  ;;  %v569_v19 = vld [vmem:[%s1139_s12] sm:$0xff] }
  0x10   :  { %838 = vmatprep.subr.bf16.mxu1 %v837_v31 }
  0x11   :  { %828 = vmatpush3.bf16.msra.mxu0 %v825_v12 }
  0x12   :  { %846 = vmatprep.subr.bf16.mxu0 %v845_v57 }
  0x14   :  { %760 = vmatmul.mubr.msk.f32.vlgmr.msra.gmra.mrb[0].mxu0 %vm69_vm0, %v51_v13 }
  0x15   :  { %848 = vmatpush3.bf16.msra.mxu0 %v845_v57 }
  0x7d   :  { %v357_v58 = vpop.permute.xlu0 %356 }
  0x81   :  { %v359_v62 = vpop.permute.xlu0 %358 }
  0xe7   :  { %v761_v21 = vpop.f32.mrb[0].mxu0 }
  0xe8   :  { %v148_v22 = vadd.f32 %v761_v21, %v687_v20  ;;  %v142_v23 = vpop.f32.mrb[1].mxu0 }
  0xe9   :  { %v143_v24 = vadd.f32 %v687_v20, %v142_v23  ;;  %v570_v20 = vld [vmem:[%s1139_s12 + $0x8] sm:$0xff]  ;;  %v572_v23 = vld [vmem:[%s1139_s12 + $0x18] sm:$0xff] }
  0xea   :  { %v154_v25 = vmul.f32 0.2, %v148_v22  ;;  %vm152_vm1 = vcmp.gt.f32.partialorder %v148_v22, 0.0  ;;  %v857_v21 = vpack.c.bf16 %v570_v20, %v569_v19 }
  0xeb   :  { %vm151_vm2 = vcmp.gt.f32.partialorder %v143_v24, 0.0  ;;  %v153_v26 = vmul.f32 0.2, %v143_v24 }
  0xec   :  { %v156_v28 = vsel %vm152_vm1, %v148_v22, %v154_v25  ;;  %858 = vmatprep.subr.bf16.mxu0 %v857_v21  ;;  %v571_v22 = vld [vmem:[%s1139_s12 + $0x10] sm:$0xff]  ;;  %v699_v25 = vld [vmem:[%s1138_s11] ss:$0 sm:$0xff]  ;;  %s904_s11 = smov [#allocation2]  }
  0xed   :  { %v155_v27 = vsel %vm151_vm2, %v143_v24, %v153_v26  ;;  %v861_v24 = vpack.c.bf16 %v572_v23, %v571_v22  ;;  %s672_s0 = sshll.u32 %s904_s11, 4  ;;  %s673_s0 = int_to_ptr.vmem [resolvable:$true] %s672_s0 }
  0xee   :  { %770 = vmatprep.mubr.msk.f32.mxu1 %vm168_vm3, %v155_v27  ;;  %s878_s30 = scalar_lea.vmem %s673_s0, 256  ;;  %p883_p1 = scmp.lt.s32.totalorder %s673_s0, %s673_s0 }
  0xef   :  { %771 = vmatmul.mubr.msk.f32.vlgmr.msra.gmra.mrb[0].mxu1 %vm168_vm3, %v156_v28  ;;  %p879_p0 = scmp.ne.s32.totalorder %s673_s0, %s878_s30  ;;  %p884_p2 = scmp.lt.s32.totalorder %s878_s30, %s878_s30 }
  0xf0   :  { %840 = vmatpush3.bf16.msra.mxu1 %v837_v31 }
  0xf1   :  { %842 = vmatprep.subr.bf16.mxu1 %v841_v34  ;;  %p885_p3 = por %p884_p2, %p883_p1 }
  0xf3   :  { %p886_p4 = pnand %p885_p3, %p879_p0 }
  0xf4   :  { %844 = vmatpush3.bf16.msra.mxu1 %v841_v34  ;;  %v702_v34 = vld [vmem:[%s1140_s13] ss:$0 sm:$0xff] }
  0xf5   :  { %850 = vmatprep.subr.bf16.mxu1 %v849_v6 }
 0x1c2   :  { %v772_v38 = vpop.f32.mrb[0].mxu1 }
 0x1c3   :  { %v247_v39 = vadd.f32 %v772_v38, %v690_v37  ;;  %v241_v40 = vpop.f32.mrb[1].mxu1 }
 0x1c4   :  { %v242_v41 = vadd.f32 %v690_v37, %v241_v40 }
 0x1c5   :  { %v253_v42 = vmul.f32 0.2, %v247_v39  ;;  %vm251_vm4 = vcmp.gt.f32.partialorder %v247_v39, 0.0 }
 0x1c6   :  { %vm250_vm5 = vcmp.gt.f32.partialorder %v242_v41, 0.0  ;;  %v252_v43 = vmul.f32 0.2, %v242_v41 }
 0x1c7   :  { %v255_v45 = vsel %vm251_vm4, %v247_v39, %v253_v42 }
 0x1c8   :  { %v254_v44 = vsel %vm250_vm5, %v242_v41, %v252_v43 }
 0x1c9   :  { %781 = vmatprep.mubr.msk.f32.mxu1 %vm168_vm3, %v254_v44 }
 0x1ca   :  { %782 = vmatmul.mubr.msk.f32.vlgmr.msra.gmra.mrb[2].mxu1 %vm168_vm3, %v255_v45 }
 0x1cb   :  { %852 = vmatpush3.bf16.msra.mxu1 %v849_v6 }
 0x1cc   :  { %854 = vmatprep.subr.bf16.mxu1 %v853_v9 }
 0x1cf   :  { %856 = vmatpush3.bf16.msra.mxu1 %v853_v9 }
 0x29d   :  { %v783_v47 = vpop.f32.mrb[2].mxu1 }
 0x29e   :  { %v345_v48 = vadd.f32 %v783_v47, %v693_v46  ;;  %v339_v49 = vpop.f32.mrb[3].mxu1 }
 0x29f   :  { %v340_v50 = vadd.f32 %v693_v46, %v339_v49 }
 0x2a0   :  { %v349_v51 = vmul.f32 0.5, %v345_v48  ;;  %666 = vst.msk [vmem:[%s1142_s15 + $0x8] sm:$0xff] %vm168_vm3, %v345_v48 }
 0x2a1   :  { %v348_v52 = vmul.f32 0.5, %v340_v50  ;;  %665 = vst.msk [vmem:[%s1142_s15] sm:$0xff] %vm168_vm3, %v340_v50  ;;  %s903_s15 = smov 112  }
 0x2a2   :  { %v352_v53 = vmul.f32 1.442695, %v349_v51 }
 0x2a3   :  { %v350_v54 = vmul.f32 1.442695, %v348_v52 }
 0x2a5   :  { %870 = vpow2.f32 %v350_v54 }
 0x2a6   :  { %872 = vpow2.f32 %v352_v53 }
 0x2af   :  { %v871_v59 = vpop.eup %870 }
 0x2b0   :  { %v362_v60 = vmul.f32 %v871_v59, %v357_v58  ;;  %v873_v61 = vpop.eup %872 }
 0x2b1   :  { %v363_v63 = vmul.f32 %v873_v61, %v359_v62 }
 0x2b2   :  { %366 = vrot.lane.b32.xlu1 %v362_v60, %s903_s15 }
 0x2b6   :  { %368 = vrot.lane.b32.xlu1 %v363_v63, %s903_s15 }
 0x324   :  { %v367_v0 = vpop.permute.xlu1 %366 }
 0x325   :  { %v372_v1 = vadd.f32 %v367_v0, %v340_v50 }
 0x327   :  { %788 = vmatprep.mubr.msk.f32.mxu0 %vm383_vm6, %v372_v1 }
 0x328   :  { %v369_v2 = vpop.permute.xlu1 %368 }
 0x329   :  { %v373_v3 = vadd.f32 %v369_v2, %v345_v48 }
 0x32b   :  { %789 = vmatmul.mubr.msk.f32.vlgmr.msra.gmra.mrb[2].mxu0 %vm383_vm6, %v373_v3 }
 0x32c   :  { %860 = vmatpush3.bf16.msra.mxu0 %v857_v21 }
 0x32d   :  { %862 = vmatprep.subr.bf16.mxu0 %v861_v24 }
 0x330   :  { %864 = vmatpush3.bf16.msra.mxu0 %v861_v24 }
 0x3fe   :  { %v790_v11 = vpop.f32.mrb[2].mxu0 }
 0x3ff   :  { %v462_v12 = vadd.f32 %v790_v11, %v696_v10  ;;  %v456_v13 = vpop.f32.mrb[3].mxu0 }
 0x400   :  { %v457_v14 = vadd.f32 %v696_v10, %v456_v13 }
 0x401   :  { %v468_v15 = vmul.f32 0.2, %v462_v12  ;;  %vm466_vm7 = vcmp.gt.f32.partialorder %v462_v12, 0.0 }
 0x402   :  { %vm465_vm8 = vcmp.gt.f32.partialorder %v457_v14, 0.0  ;;  %v467_v16 = vmul.f32 0.2, %v457_v14 }
 0x403   :  { %v470_v18 = vsel %vm466_vm7, %v462_v12, %v468_v15 }
 0x404   :  { %v469_v17 = vsel %vm465_vm8, %v457_v14, %v467_v16 }
 0x405   :  { %799 = vmatprep.mubr.msk.f32.mxu1 %vm168_vm3, %v469_v17 }
 0x406   :  { %800 = vmatmul.mubr.msk.f32.vlgmr.msra.gmra.mrb[4].mxu1 %vm168_vm3, %v470_v18 }
 0x4d9   :  { %v801_v26 = vpop.f32.mrb[4].mxu1 }
 0x4da   :  { %v560_v27 = vadd.f32 %v801_v26, %v699_v25  ;;  %v554_v28 = vpop.f32.mrb[5].mxu1 }
 0x4db   :  { %v555_v29 = vadd.f32 %v699_v25, %v554_v28 }
 0x4dc   :  { %v566_v30 = vmul.f32 0.2, %v560_v27  ;;  %vm564_vm9 = vcmp.gt.f32.partialorder %v560_v27, 0.0 }
 0x4dd   :  { %vm563_vm10 = vcmp.gt.f32.partialorder %v555_v29, 0.0  ;;  %v565_v31 = vmul.f32 0.2, %v555_v29 }
 0x4de   :  { %v568_v33 = vsel %vm564_vm9, %v560_v27, %v566_v30 }
 0x4df   :  { %v567_v32 = vsel %vm563_vm10, %v555_v29, %v565_v31 }
 0x4e0   :  { %810 = vmatprep.mubr.msk.f32.mxu0 %vm168_vm3, %v567_v32 }
 0x4e1   :  { %811 = vmatmul.mubr.msk.f32.vlgmr.msra.gmra.mrb[4].mxu0 %vm168_vm3, %v568_v33 }
 0x5b4   :  { %v812_v35 = vpop.f32.mrb[4].mxu0 }
 0x5b5   :  { %v658_v36 = vadd.f32 %v812_v35, %v702_v34  ;;  %v652_v37 = vpop.f32.mrb[5].mxu0 }
 0x5b6   :  { %v653_v38 = vadd.f32 %v702_v34, %v652_v37 }
 0x5b7   :  { %874 = vtanh.f32 %v658_v36 }
 0x5b8   :  { %876 = vtanh.f32 %v653_v38 }
 0x5c1   :  { %v875_v39 = vpop.eup %874 }
 0x5c2   :  { %v877_v40 = vpop.eup %876  ;;  %664 = vst.msk [vmem:[#allocation2 + $0x8] sm:$0xff] %vm69_vm0, %v875_v39 }
 0x5c3   :  { %663 = vst.msk [vmem:[#allocation2] sm:$0xff] %vm69_vm0, %v877_v40 }
 0x5c4   :  { %889 = shalt.err (!%p886_p4)
}
 0x5c5   :  { %s890_s4 = scalar_lea.hbm %s1141_s14, 256 }
 0x5c6   :  { %p891_p5 = scmp.ne.s32.totalorder %s1141_s14, %s890_s4  ;;  %p894_p6 = scmp.lt.u32.totalorder %s890_s4, %s1141_s14 }
 0x5c8   :  { %p896_p7 = pnand %p894_p6, %p891_p5 }
 0x5ca   :  { %899 = shalt.err (!%p896_p7)
}
 0x5cb   :  { %s905_s17 = smov 128   ;;  %s906_s18 = smov 8  }
 0x5cc   :  { %678 = dma.vmem_to_hbm [thread:$0]  %s673_s0, 256, %s1141_s14, [#allocation3], %s905_s17, %s905_s17, %s906_s18  }
 0x5cd   :  { %900 = dma.done.wait [#allocation3], 256  }
 0x5ce   :  { %901 = vsyncadd [#allocation3], 4294967040 }
 0x5cf   :  { %686 = vsyncpa [#allocation3], 1 }

</bundles_post_ra>
